<compile_context>
chip_gen: v7x
topology: tpu7x:2x2x1
jax: 0.10.0
libtpu: 0.0.40
codegen_flags: <defaults>
</compile_context>

<pallas_src>
import jax
import jax.numpy as jnp
from jax.experimental import pallas as pl
from jax.experimental.pallas import tpu as pltpu


def _round_up(n, m):
    return ((n + m - 1) // m) * m


def _vmem_capacity_bytes():
    """Per-core VMEM capacity; falls back to the smallest (v7x, 64 MiB) value."""
    try:
        return int(pltpu.get_tpu_info().vmem_capacity_bytes)
    except Exception:
        return 64 << 20


def _device_kind():
    try:
        return jax.devices()[0].device_kind.lower()
    except Exception:
        return ""


# ---------------------------------------------------------------------------
# Kernels
# ---------------------------------------------------------------------------

def _ffn_kernel_resident(x_ref, w1_ref, b1_ref, w2_ref, b2_ref, o_ref):
    """Whole-d_ff weights resident in VMEM; single pass, no accumulator."""
    # First matmul on the MXU: bf16 operands, f32 accumulate.
    h = jnp.dot(x_ref[...], w1_ref[...], preferred_element_type=jnp.float32)
    # Bias + ReLU in f32 on the VPU.
    h = jnp.maximum(h + b1_ref[...], 0.0)
    # dropout (eval mode) == identity
    # TODO(synk): training-mode dropout could use pltpu.prng_seed + pltpu.stateful_bernoulli.
    y = jnp.dot(h.astype(jnp.bfloat16), w2_ref[...],
                preferred_element_type=jnp.float32)
    o_ref[...] = (y + b2_ref[...]).astype(o_ref.dtype)


def _ffn_kernel_tiled(x_ref, w1_ref, b1_ref, w2_ref, b2_ref, o_ref, acc_ref):
    """d_ff tiled as a trailing reduction axis with an f32 VMEM accumulator."""
    k = pl.program_id(1)

    @pl.when(k == 0)
    def _():
        acc_ref[...] = jnp.zeros_like(acc_ref)

    h = jnp.dot(x_ref[...], w1_ref[...], preferred_element_type=jnp.float32)
    h = jnp.maximum(h + b1_ref[...], 0.0)
    acc_ref[...] += jnp.dot(h.astype(jnp.bfloat16), w2_ref[...],
                            preferred_element_type=jnp.float32)

    @pl.when(k == pl.num_programs(1) - 1)
    def _():
        o_ref[...] = (acc_ref[...] + b2_ref[...]).astype(o_ref.dtype)


# ---------------------------------------------------------------------------
# Wrapper
# ---------------------------------------------------------------------------

def positionwise_feed_forward(x, w1, b1, w2, b2, *, row_tile=None, ff_tile=None):
    """x: (B, S, d_model); w1: (d_ff, d_model), b1: (d_ff,),
    w2: (d_model, d_ff), b2: (d_model,)  — PyTorch nn.Linear parameter shapes."""
    B, S, d_model = x.shape
    d_ff = w1.shape[0]
    out_dtype = x.dtype
    out_itemsize = jnp.dtype(out_dtype).itemsize

    n_rows = B * S
    d_model_p = _round_up(d_model, 128)        # lane-dense loads & output stores
    d_ff_p128 = _round_up(d_ff, 128)

    vmem_cap = _vmem_capacity_bytes()
    # Reserve headroom for Mosaic internal scratch; never plan past 3/4 of VMEM.
    vmem_budget = min(vmem_cap - (16 << 20), (vmem_cap * 3) // 4)

    is_v5 = "v5" in _device_kind()
    tk_align = 128 if is_v5 else 256           # MXU: 4x128^2 on v5e, 2x256^2 later

    # --- d_ff tiling: prefer whole-weight residency -------------------------
    weight_bytes = 2 * d_model_p * d_ff_p128 * 2       # bf16 W1^T + W2^T
    resident = weight_bytes <= vmem_budget // 4
    if resident:
        tk_ff = d_ff_p128
        d_ff_p = d_ff_p128
    else:
        tk_ff = ff_tile if ff_tile is not None else 2048
        tk_ff = max(tk_align, (tk_ff // tk_align) * tk_align)
        tk_ff = min(tk_ff, _round_up(d_ff, tk_align))
        d_ff_p = _round_up(d_ff, tk_ff)

    # --- row tile ------------------------------------------------------------
    if row_tile is None:
        if resident:
            row_tile = 512
        else:
            # Streamed weights: arithmetic intensity ~ row_tile flops / weight byte.
            # v6e/v7x need ~620-700 to be MXU-bound; v5e is already bound at 512.
            row_tile = 512 if is_v5 else 1024
    row_tile = max(16, (row_tile // 16) * 16)          # bf16 packs 2 rows/sublane
    row_tile = min(row_tile, _round_up(n_rows, 16))

    # Megacore occupancy (v7x: 2 TensorCores share the 'parallel' row axis):
    # prefer at least 2 row tiles.
    while row_tile > 16 and n_rows <= row_tile:
        row_tile = max(16, _round_up(row_tile // 2, 16))

    # --- shrink tiles until the VMEM footprint fits --------------------------
    def _vmem_need(rt, tk):
        need = (
            2 * rt * d_model_p * 2                     # x tile bf16 (double buffered)
            + 2 * rt * d_model_p * out_itemsize        # out tile (double buffered)
            + 6 * rt * tk                              # (rt, tk) f32 intermediate + bf16 copy
            + 2 * 8 * (tk + d_model_p) * 4             # biases (sublane-padded f32)
        )
        if resident:
            need += 2 * d_model_p * tk * 2             # W1^T + W2^T, single buffer each
        else:
            need += 2 * (2 * d_model_p * tk * 2)       # double-buffered weight tiles
            need += rt * d_model_p * 4                 # f32 accumulator scratch
        return need

    while _vmem_need(row_tile, tk_ff) > vmem_budget:
        if row_tile > 128:
            row_tile = max(128, _round_up(row_tile // 2, 16))
        elif (not resident) and tk_ff > tk_align:
            tk_ff = max(tk_align, _round_up(tk_ff // 2, tk_align))
            d_ff_p = _round_up(d_ff, tk_ff)
        elif row_tile > 16:
            row_tile = max(16, _round_up(row_tile // 2, 16))
        else:
            break

    n_rows_p = _round_up(n_rows, row_tile)

    # --- wrapper-side glue: flatten, cast MXU operands to bf16, zero-pad -----
    x2d = x.reshape(n_rows, d_model).astype(jnp.bfloat16)
    if n_rows_p != n_rows or d_model_p != d_model:
        x2d = jnp.pad(x2d, ((0, n_rows_p - n_rows), (0, d_model_p - d_model)))

    w1_t = w1.T.astype(jnp.bfloat16)                   # (d_model, d_ff)
    w2_t = w2.T.astype(jnp.bfloat16)                   # (d_ff, d_model)
    b1_2d = b1.reshape(1, d_ff).astype(jnp.float32)
    b2_2d = b2.reshape(1, d_model).astype(jnp.float32)
    if d_model_p != d_model or d_ff_p != d_ff:
        w1_t = jnp.pad(w1_t, ((0, d_model_p - d_model), (0, d_ff_p - d_ff)))
        w2_t = jnp.pad(w2_t, ((0, d_ff_p - d_ff), (0, d_model_p - d_model)))
        b1_2d = jnp.pad(b1_2d, ((0, 0), (0, d_ff_p - d_ff)))
        b2_2d = jnp.pad(b2_2d, ((0, 0), (0, d_model_p - d_model)))

    # Advisory cost estimate for XLA's scheduler.
    flops = 2 * n_rows_p * d_model_p * d_ff_p * 2
    bytes_accessed = int(x2d.size * 2 + w1_t.size * 2 + w2_t.size * 2
                         + b1_2d.size * 4 + b2_2d.size * 4
                         + n_rows_p * d_model_p * out_itemsize)
    if not resident:
        # Weights are re-streamed from HBM once per row tile in the tiled path.
        bytes_accessed += int((w1_t.size + w2_t.size) * 2
                              * max(n_rows_p // row_tile - 1, 0))

    vmem_limit = int(min(max((_vmem_need(row_tile, tk_ff) * 5) // 4, 32 << 20),
                         vmem_budget))
    compiler_params_kwargs = dict(vmem_limit_bytes=vmem_limit)
    cost = pl.CostEstimate(flops=int(flops), transcendentals=0,
                           bytes_accessed=bytes_accessed)

    if resident:
        # Single k step: weight/bias blocks have constant indices -> DMA'd once;
        # Buffered(1) avoids a pointless second VMEM buffer for them.
        def _const_spec(block_shape):
            idx = lambda i: (0, 0)
            buffered = getattr(pl, "Buffered", None)
            if buffered is not None:
                try:
                    return pl.BlockSpec(block_shape, idx,
                                        pipeline_mode=buffered(1))
                except TypeError:
                    pass
            return pl.BlockSpec(block_shape, idx)

        out2d = pl.pallas_call(
            _ffn_kernel_resident,
            out_shape=jax.ShapeDtypeStruct((n_rows_p, d_model_p), out_dtype),
            grid_spec=pltpu.PrefetchScalarGridSpec(
                num_scalar_prefetch=0,
                grid=(n_rows_p // row_tile,),
                in_specs=[
                    pl.BlockSpec((row_tile, d_model_p), lambda i: (i, 0)),  # x rows
                    _const_spec((d_model_p, d_ff_p)),                       # W1^T
                    _const_spec((1, d_ff_p)),                               # b1
                    _const_spec((d_ff_p, d_model_p)),                       # W2^T
                    _const_spec((1, d_model_p)),                            # b2
                ],
                out_specs=pl.BlockSpec((row_tile, d_model_p), lambda i: (i, 0)),
            ),
            compiler_params=pltpu.CompilerParams(
                dimension_semantics=("parallel",), **compiler_params_kwargs),
            cost_estimate=cost,
        )(x2d, w1_t, b1_2d, w2_t, b2_2d)
    else:
        out2d = pl.pallas_call(
            _ffn_kernel_tiled,
            out_shape=jax.ShapeDtypeStruct((n_rows_p, d_model_p), out_dtype),
            grid_spec=pltpu.PrefetchScalarGridSpec(
                num_scalar_prefetch=0,
                grid=(n_rows_p // row_tile, d_ff_p // tk_ff),
                in_specs=[
                    pl.BlockSpec((row_tile, d_model_p), lambda i, k: (i, 0)),  # x rows
                    pl.BlockSpec((d_model_p, tk_ff), lambda i, k: (0, k)),     # W1^T
                    pl.BlockSpec((1, tk_ff), lambda i, k: (0, k)),             # b1
                    pl.BlockSpec((tk_ff, d_model_p), lambda i, k: (k, 0)),     # W2^T
                    pl.BlockSpec((1, d_model_p), lambda i, k: (0, 0)),         # b2
                ],
                out_specs=pl.BlockSpec((row_tile, d_model_p), lambda i, k: (i, 0)),
                scratch_shapes=[pltpu.VMEM((row_tile, d_model_p), jnp.float32)],
            ),
            compiler_params=pltpu.CompilerParams(
                dimension_semantics=("parallel", "arbitrary"),
                **compiler_params_kwargs),
            cost_estimate=cost,
        )(x2d, w1_t, b1_2d, w2_t, b2_2d)

    return out2d[:n_rows, :d_model].reshape(B, S, d_model)


if __name__ == "__main__":
    # Shapes from the module spec (d_model=512, d_ff=64), small batch/seq.
    B, S, d_model, d_ff = 2, 8, 512, 64

    key = jax.random.PRNGKey(0)
    kx, kw1, kb1, kw2, kb2 = jax.random.split(key, 5)

    # Deterministic parameter init (PyTorch Linear shapes: weight = (out, in)).
    bound1 = 1.0 / (d_model ** 0.5)
    bound2 = 1.0 / (d_ff ** 0.5)
    w1 = jax.random.uniform(kw1, (d_ff, d_model), jnp.float32, -bound1, bound1)
    b1 = jax.random.uniform(kb1, (d_ff,), jnp.float32, -bound1, bound1)
    w2 = jax.random.uniform(kw2, (d_model, d_ff), jnp.float32, -bound2, bound2)
    b2 = jax.random.uniform(kb2, (d_model,), jnp.float32, -bound2, bound2)

    x = jax.random.normal(kx, (B, S, d_model), jnp.float32)

    out = positionwise_feed_forward(x, w1, b1, w2, b2)
    out = jax.block_until_ready(out)
    assert out.shape == (B, S, d_model)

    # Reference matching kernel precision (bf16 MXU operands, f32 accumulate).
    x_bf = x.reshape(-1, d_model).astype(jnp.bfloat16)
    h_ref = jnp.dot(x_bf, w1.T.astype(jnp.bfloat16),
                    preferred_element_type=jnp.float32) + b1
    h_ref = jnp.maximum(h_ref, 0.0).astype(jnp.bfloat16)
    ref_bf16 = (jnp.dot(h_ref, w2.T.astype(jnp.bfloat16),
                        preferred_element_type=jnp.float32)
                + b2).reshape(B, S, d_model)

    # Pure-f32 reference (eval-mode dropout == identity). Intentional precision
    # tradeoff: activations/weights are cast to bf16 for the MXU.
    ref_f32 = jnp.maximum(x @ w1.T + b1, 0.0) @ w2.T + b2

    assert jnp.allclose(out, ref_bf16, atol=1e-2, rtol=1e-2), \
        "mismatch vs bf16-precision reference"
    assert jnp.allclose(out, ref_f32, atol=5e-2, rtol=5e-2), \
        "mismatch vs f32 reference"

    print("KERNEL_OK")
</pallas_src>

<mosaic_0001>
module attributes {stable_mosaic.version = 11 : i64} {
  func.func @_ffn_kernel_resident(%arg0: i32, %arg1: memref<16x512xbf16, #tpu.memory_space<vmem>>, %arg2: memref<512x128xbf16, #tpu.memory_space<vmem>>, %arg3: memref<1x128xf32, #tpu.memory_space<vmem>>, %arg4: memref<128x512xbf16, #tpu.memory_space<vmem>>, %arg5: memref<1x512xf32, #tpu.memory_space<vmem>>, %arg6: memref<16x512xf32, #tpu.memory_space<vmem>>) attributes {dimension_semantics = [#tpu.dimension_semantics<parallel>], iteration_bounds = array<i64: 1>, scalar_prefetch = 0 : i64, scratch_operands = 0 : i64, tpu.core_type = #tpu.core_type<tc>, window_params = [{transform_indices = @transform_0, window_bounds = array<i64: 16, 512>}, {pipeline_mode = #tpu.pipeline_mode<synchronous>, transform_indices = @transform_1, window_bounds = array<i64: 512, 128>}, {pipeline_mode = #tpu.pipeline_mode<synchronous>, transform_indices = @transform_2, window_bounds = array<i64: 1, 128>}, {pipeline_mode = #tpu.pipeline_mode<synchronous>, transform_indices = @transform_3, window_bounds = array<i64: 128, 512>}, {pipeline_mode = #tpu.pipeline_mode<synchronous>, transform_indices = @transform_4, window_bounds = array<i64: 1, 512>}, {transform_indices = @transform_5, window_bounds = array<i64: 16, 512>}]} {
    %c0 = arith.constant 0 : index
    %c0_0 = arith.constant 0 : index
    %0 = vector.load %arg1[%c0, %c0_0] : memref<16x512xbf16, #tpu.memory_space<vmem>>, vector<16x512xbf16>
    %c0_1 = arith.constant 0 : index
    %c0_2 = arith.constant 0 : index
    %1 = vector.load %arg2[%c0_1, %c0_2] : memref<512x128xbf16, #tpu.memory_space<vmem>>, vector<512x128xbf16>
    %cst = arith.constant dense<0.000000e+00> : vector<16x128xf32>
    %2 = tpu.matmul %0, %1, %cst {dimension_numbers = #tpu.dot_dimension_numbers<[1], [0], [0], [1], [0, 0, 1, 1], [], []>} : vector<16x512xbf16>, vector<512x128xbf16>, vector<16x128xf32> -> vector<16x128xf32>
    %c0_3 = arith.constant 0 : index
    %c0_4 = arith.constant 0 : index
    %3 = vector.load %arg3[%c0_3, %c0_4] : memref<1x128xf32, #tpu.memory_space<vmem>>, vector<1x128xf32>
    %4 = vector.broadcast %3 : vector<1x128xf32> to vector<16x128xf32>
    %5 = arith.addf %2, %4 : vector<16x128xf32>
    %cst_5 = arith.constant 0.000000e+00 : f32
    %6 = vector.broadcast %cst_5 : f32 to vector<16x128xf32>
    %7 = arith.maximumf %5, %6 : vector<16x128xf32>
    %8 = arith.truncf %7 : vector<16x128xf32> to vector<16x128xbf16>
    %c0_6 = arith.constant 0 : index
    %c0_7 = arith.constant 0 : index
    %9 = vector.load %arg4[%c0_6, %c0_7] : memref<128x512xbf16, #tpu.memory_space<vmem>>, vector<128x512xbf16>
    %cst_8 = arith.constant dense<0.000000e+00> : vector<16x512xf32>
    %10 = tpu.matmul %8, %9, %cst_8 {dimension_numbers = #tpu.dot_dimension_numbers<[1], [0], [0], [1], [0, 0, 1, 1], [], []>} : vector<16x128xbf16>, vector<128x512xbf16>, vector<16x512xf32> -> vector<16x512xf32>
    %c0_9 = arith.constant 0 : index
    %c0_10 = arith.constant 0 : index
    %11 = vector.load %arg5[%c0_9, %c0_10] : memref<1x512xf32, #tpu.memory_space<vmem>>, vector<1x512xf32>
    %12 = vector.broadcast %11 : vector<1x512xf32> to vector<16x512xf32>
    %13 = arith.addf %10, %12 : vector<16x512xf32>
    %c0_11 = arith.constant 0 : index
    %c0_12 = arith.constant 0 : index
    %14 = vector.load %arg6[%c0_11, %c0_12] : memref<16x512xf32, #tpu.memory_space<vmem>>, vector<16x512xf32>
    tpu.vector_store %arg6[%c0_11, %c0_12], %13 {strides = array<i32>} : memref<16x512xf32, #tpu.memory_space<vmem>>, vector<16x512xf32>,
    return
  }
  func.func @transform_0(%arg0: i32) -> (i32, i32) {
    %c0_i32 = arith.constant 0 : i32
    %c0_i32_0 = arith.constant 0 : i32
    return %arg0, %c0_i32 : i32, i32
  }
  func.func @transform_1(%arg0: i32) -> (i32, i32) {
    %c0_i32 = arith.constant 0 : i32
    %c0_i32_0 = arith.constant 0 : i32
    %c0_i32_1 = arith.constant 0 : i32
    return %c0_i32, %c0_i32_0 : i32, i32
  }
  func.func @transform_2(%arg0: i32) -> (i32, i32) {
    %c0_i32 = arith.constant 0 : i32
    %c0_i32_0 = arith.constant 0 : i32
    %c0_i32_1 = arith.constant 0 : i32
    return %c0_i32, %c0_i32_0 : i32, i32
  }
  func.func @transform_3(%arg0: i32) -> (i32, i32) {
    %c0_i32 = arith.constant 0 : i32
    %c0_i32_0 = arith.constant 0 : i32
    %c0_i32_1 = arith.constant 0 : i32
    return %c0_i32, %c0_i32_0 : i32, i32
  }
  func.func @transform_4(%arg0: i32) -> (i32, i32) {
    %c0_i32 = arith.constant 0 : i32
    %c0_i32_0 = arith.constant 0 : i32
    %c0_i32_1 = arith.constant 0 : i32
    return %c0_i32, %c0_i32_0 : i32, i32
  }
  func.func @transform_5(%arg0: i32) -> (i32, i32) {
    %c0_i32 = arith.constant 0 : i32
    %c0_i32_0 = arith.constant 0 : i32
    return %arg0, %c0_i32 : i32, i32
  }
}

</mosaic_0001>

<bundles_post_ra>
// kernel: tpu_custom_call.1
= control target key start
LH: loop header
LB: loop body
LE: loop exit
PB: predicated region body
PF: predicated region fallthrough
CT: control target
= control target key end

     0   :  { %10 = vsyncpa [#allocation3], 0  ;;  %s1160_s0 = inlined_call_operand.hbm [shape: bf16[16,512], index: 0, kind: input, shape index: {}]   ;;  %s1161_s1 = inlined_call_operand.hbm [shape: bf16[512,128], index: 1, kind: input, shape index: {}]   ;;  %s1162_s2 = inlined_call_operand.vmem [shape: f32[1,128], index: 2, kind: input, shape index: {}]   ;;  %s1163_s3 = inlined_call_operand.hbm [shape: bf16[128,512], index: 3, kind: input, shape index: {}]   ;;  %s1164_s4 = inlined_call_operand.vmem [shape: f32[1,512], index: 4, kind: input, shape index: {}]   ;;  %s1165_s5 = inlined_call_operand.hbm [shape: f32[16,512], index: 5, kind: output, shape index: {}]  }
   0x1   :  { %11 = vsyncpa [#allocation6], 0 }
   0x2   :  { %12 = vsyncpa [#allocation4], 0  ;;  %s1065_s18 = smov [#allocation5]   ;;  %s971_s22 = scalar_lea.hbm %s1161_s1, 4096 }
   0x3   :  { %s30_s19 = sshll.u32 %s1065_s18, 4  ;;  %p972_p0 = scmp.ne.s32.totalorder %s1161_s1, %s971_s22  ;;  %s31_s19 = int_to_ptr.vmem [resolvable:$true] %s30_s19 }
   0x4   :  { %p975_p1 = scmp.lt.u32.totalorder %s971_s22, %s1161_s1 }
   0x6   :  { %p977_p2 = pnand %p975_p1, %p972_p0 }
   0x8   :  { %980 = shalt.err (!%p977_p2)
}
   0x9   :  { %s981_s27 = scalar_lea.vmem %s31_s19, 4096  ;;  %p986_p4 = scmp.lt.s32.totalorder %s31_s19, %s31_s19 }
   0xa   :  { %p982_p3 = scmp.ne.s32.totalorder %s31_s19, %s981_s27  ;;  %p987_p5 = scmp.lt.s32.totalorder %s981_s27, %s981_s27 }
   0xc   :  { %p988_p6 = por %p987_p5, %p986_p4 }
   0xe   :  { %p989_p7 = pnand %p988_p6, %p982_p3 }
  0x10   :  { %992 = shalt.err (!%p989_p7)
}
  0x11   :  { %s1066_s28 = smov 64   ;;  %s1067_s29 = smov 4  }
  0x12   :  { %36 = dma.hbm_to_vmem [thread:$0]  %s1161_s1, 4096, %s31_s19, [#allocation6], %s1066_s28, %s1066_s28, %s1067_s29  }
  0x13   :  { %s1068_s7 = smov [#allocation2]   ;;  %s993_s11 = scalar_lea.hbm %s1160_s0, 512 }
  0x14   :  { %s18_s8 = sshll.u32 %s1068_s7, 4  ;;  %p994_p8 = scmp.ne.s32.totalorder %s1160_s0, %s993_s11  ;;  %s19_s8 = int_to_ptr.vmem [resolvable:$true] %s18_s8 }
  0x15   :  { %p997_p9 = scmp.lt.u32.totalorder %s993_s11, %s1160_s0 }
  0x17   :  { %p999_p10 = pnand %p997_p9, %p994_p8 }
  0x19   :  { %1002 = shalt.err (!%p999_p10)
}
  0x1a   :  { %s1003_s16 = scalar_lea.vmem %s19_s8, 512  ;;  %p1008_p12 = scmp.lt.s32.totalorder %s19_s8, %s19_s8 }
  0x1b   :  { %p1004_p11 = scmp.ne.s32.totalorder %s19_s8, %s1003_s16  ;;  %p1009_p13 = scmp.lt.s32.totalorder %s1003_s16, %s1003_s16 }
  0x1d   :  { %p1010_p0 = por %p1009_p13, %p1008_p12 }
  0x1f   :  { %p1011_p1 = pnand %p1010_p0, %p1004_p11 }
  0x21   :  { %1014 = shalt.err (!%p1011_p1)
}
  0x22   :  { %s1069_s1 = smov 256   ;;  %s1070_s17 = smov 16  }
  0x23   :  { %24 = dma.hbm_to_vmem [thread:$0]  %s1160_s0, 512, %s19_s8, [#allocation3], %s1069_s1, %s1069_s1, %s1070_s17  }
  0x24   :  { %s1071_s20 = smov [#allocation7]   ;;  %s1015_s24 = scalar_lea.hbm %s1163_s3, 4096 }
  0x25   :  { %s44_s21 = sshll.u32 %s1071_s20, 4  ;;  %p1016_p2 = scmp.ne.s32.totalorder %s1163_s3, %s1015_s24  ;;  %s45_s21 = int_to_ptr.vmem [resolvable:$true] %s44_s21 }
  0x26   :  { %p1019_p3 = scmp.lt.u32.totalorder %s1015_s24, %s1163_s3 }
  0x28   :  { %p1021_p4 = pnand %p1019_p3, %p1016_p2 }
  0x2a   :  { %1024 = shalt.err (!%p1021_p4)
}
  0x2b   :  { %s1025_s29 = scalar_lea.vmem %s45_s21, 4096  ;;  %p1030_p6 = scmp.lt.s32.totalorder %s45_s21, %s45_s21 }
  0x2c   :  { %p1026_p5 = scmp.ne.s32.totalorder %s45_s21, %s1025_s29  ;;  %p1031_p7 = scmp.lt.s32.totalorder %s1025_s29, %s1025_s29 }
  0x2e   :  { %p1032_p8 = por %p1031_p7, %p1030_p6 }
  0x30   :  { %p1033_p9 = pnand %p1032_p8, %p1026_p5 }
  0x32   :  { %1036 = shalt.err (!%p1033_p9)
}
  0x33   :  { %50 = dma.hbm_to_vmem [thread:$0]  %s1163_s3, 4096, %s45_s21, [#allocation6], %s1069_s1, %s1069_s1, %s1070_s17  }
  0x34   :  { %1059 = dma.done.wait [#allocation3], 512  }
  0x35   :  { %1060 = vsyncadd [#allocation3], 4294966784 }
  0x36   :  { %1061 = dma.done.wait [#allocation6], 8192  }
  0x37   :  { %1062 = vsyncadd [#allocation6], 4294959104  ;;  %v885_v0 = vld [vmem:[#allocation5 + $0x40] sm:$0xff]   ;;  %v889_v4 = vld [vmem:[#allocation5 + $0x48] sm:$0xff]   ;;  %s1073_s8 = smov [#allocation8]  }
  0x38   :  { %v886_v1 = vld [vmem:[#allocation5 + $0xc0] sm:$0xff]   ;;  %830 = vmatprep.subr.bf16.mxu0 %v885_v0  ;;  %v890_v5 = vld [vmem:[#allocation5 + $0xc8] sm:$0xff]   ;;  %v893_v8 = vld [vmem:[#allocation5 + $0x50] sm:$0xff]   ;;  %s748_s9 = sshll.u32 %s1073_s8, 4  ;;  %s749_s9 = int_to_ptr.vmem [resolvable:$true] %s748_s9 }
  0x39   :  { %v887_v2 = vld [vmem:[#allocation5] sm:$0xff]   ;;  %852 = vmatprep.subr.bf16.mxu1 %v886_v1  ;;  %v891_v6 = vld [vmem:[#allocation5 + $0x8] sm:$0xff]   ;;  %v894_v9 = vld [vmem:[#allocation5 + $0xd0] sm:$0xff]   ;;  %p1042_p11 = scmp.lt.s32.totalorder %s749_s9, %s749_s9 }
  0x3a   :  { %v888_v3 = vld [vmem:[#allocation5 + $0x80] sm:$0xff]   ;;  %831 = vmatpush3.bf16.msra.mxu0 %v887_v2  ;;  %v892_v7 = vld [vmem:[#allocation5 + $0x88] sm:$0xff]   ;;  %v895_v10 = vld [vmem:[#allocation5 + $0x10] sm:$0xff]  }
  0x3b   :  { %853 = vmatpush3.bf16.msra.mxu1 %v888_v3  ;;  %832 = vmatprep.subr.bf16.mxu0 %v889_v4  ;;  %v896_v11 = vld [vmem:[#allocation5 + $0x90] sm:$0xff]   ;;  %v897_v12 = vld [vmem:[#allocation5 + $0x58] sm:$0xff]   ;;  %v901_v16 = vld [vmem:[#allocation5 + $0x60] sm:$0xff]   ;;  %v1072_v4 = vmov 0  }
  0x3c   :  { %854 = vmatprep.subr.bf16.mxu1 %v890_v5  ;;  %v898_v13 = vld [vmem:[#allocation5 + $0xd8] sm:$0xff]   ;;  %v902_v17 = vld [vmem:[#allocation5 + $0xe0] sm:$0xff]   ;;  %v905_v20 = vld [vmem:[#allocation5 + $0x68] sm:$0xff]  }
  0x3d   :  { %v899_v14 = vld [vmem:[#allocation5 + $0x18] sm:$0xff]   ;;  %v903_v18 = vld [vmem:[#allocation5 + $0x20] sm:$0xff]   ;;  %v906_v21 = vld [vmem:[#allocation5 + $0xe8] sm:$0xff]  }
  0x3e   :  { %833 = vmatpush3.bf16.msra.mxu0 %v891_v6  ;;  %v900_v15 = vld [vmem:[#allocation5 + $0x98] sm:$0xff]   ;;  %v904_v19 = vld [vmem:[#allocation5 + $0xa0] sm:$0xff]   ;;  %v907_v22 = vld [vmem:[#allocation5 + $0x28] sm:$0xff]  }
  0x3f   :  { %855 = vmatpush3.bf16.msra.mxu1 %v892_v7  ;;  %834 = vmatprep.subr.bf16.mxu0 %v893_v8  ;;  %v908_v23 = vld [vmem:[#allocation5 + $0xa8] sm:$0xff]   ;;  %v909_v24 = vld [vmem:[#allocation5 + $0x70] sm:$0xff]   ;;  %v913_v28 = vld [vmem:[#allocation5 + $0x78] sm:$0xff]  }
  0x40   :  { %856 = vmatprep.subr.bf16.mxu1 %v894_v9  ;;  %v910_v25 = vld [vmem:[#allocation5 + $0xf0] sm:$0xff]   ;;  %v914_v29 = vld [vmem:[#allocation5 + $0xf8] sm:$0xff]   ;;  %v761_v7 = vld [vmem:[%s1162_s2] ss:$0 sm:$0xff] }
  0x41   :  { %v911_v26 = vld [vmem:[#allocation5 + $0x30] sm:$0xff]   ;;  %v915_v30 = vld [vmem:[#allocation5 + $0x38] sm:$0xff]  }
  0x42   :  { %835 = vmatpush3.bf16.msra.mxu0 %v895_v10  ;;  %v912_v27 = vld [vmem:[#allocation5 + $0xb0] sm:$0xff]   ;;  %v916_v31 = vld [vmem:[#allocation5 + $0xb8] sm:$0xff]  }
  0x43   :  { %857 = vmatpush3.bf16.msra.mxu1 %v896_v11  ;;  %836 = vmatprep.subr.bf16.mxu0 %v897_v12  ;;  %v917_v32 = vld [vmem:[#allocation2] ss:$16 sps:$4 sm:$0xff]   ;;  %v919_v33 = vld [vmem:[#allocation2 + $0x4] ss:$16 sps:$4 sm:$0xff]   ;;  %v920_v34 = vld [vmem:[#allocation2 + $0x8] ss:$16 sps:$4 sm:$0xff]  }
  0x44   :  { %858 = vmatprep.subr.bf16.mxu1 %v898_v13  ;;  %v922_v35 = vld [vmem:[#allocation2 + $0xc] ss:$16 sps:$4 sm:$0xff]   ;;  %382 = vmatprep.mubr.bf16.mxu0 %v919_v33  ;;  %v923_v36 = vld [vmem:[#allocation7] ss:$16 sps:$4 sm:$0xff]   ;;  %v925_v37 = vld [vmem:[#allocation7 + $0x4] ss:$16 sps:$4 sm:$0xff]  }
  0x45   :  { %423 = vmatprep.mubr.bf16.mxu1 %v922_v35  ;;  %v926_v38 = vld [vmem:[#allocation7 + $0x8] ss:$16 sps:$4 sm:$0xff]   ;;  %v928_v39 = vld [vmem:[#allocation7 + $0xc] ss:$16 sps:$4 sm:$0xff]   ;;  %v929_v40 = vld [vmem:[#allocation7 + $0x20] ss:$16 sps:$4 sm:$0xff]  }
  0x46   :  { %837 = vmatpush3.bf16.msra.mxu0 %v899_v14  ;;  %v931_v41 = vld [vmem:[#allocation7 + $0x24] ss:$16 sps:$4 sm:$0xff]   ;;  %v934_v42 = vld [vmem:[#allocation7 + $0x2c] ss:$16 sps:$4 sm:$0xff]   ;;  %v932_v43 = vld [vmem:[#allocation7 + $0x28] ss:$16 sps:$4 sm:$0xff]  }
  0x47   :  { %859 = vmatpush3.bf16.msra.mxu1 %v900_v15  ;;  %838 = vmatprep.subr.bf16.mxu0 %v901_v16  ;;  %v937_v44 = vld [vmem:[#allocation7 + $0x44] ss:$16 sps:$4 sm:$0xff]   ;;  %v935_v45 = vld [vmem:[#allocation7 + $0x40] ss:$16 sps:$4 sm:$0xff]   ;;  %v940_v46 = vld [vmem:[#allocation7 + $0x4c] ss:$16 sps:$4 sm:$0xff]  }
  0x48   :  { %860 = vmatprep.subr.bf16.mxu1 %v902_v17  ;;  %v943_v47 = vld [vmem:[#allocation7 + $0x64] ss:$16 sps:$4 sm:$0xff]   ;;  %v938_v48 = vld [vmem:[#allocation7 + $0x48] ss:$16 sps:$4 sm:$0xff]   ;;  %v946_v49 = vld [vmem:[#allocation7 + $0x6c] ss:$16 sps:$4 sm:$0xff]  }
  0x49   :  { %v941_v50 = vld [vmem:[#allocation7 + $0x60] ss:$16 sps:$4 sm:$0xff]   ;;  %v944_v51 = vld [vmem:[#allocation7 + $0x68] ss:$16 sps:$4 sm:$0xff]   ;;  %v949_v52 = vld [vmem:[#allocation7 + $0x84] ss:$16 sps:$4 sm:$0xff]  }
  0x4a   :  { %839 = vmatpush3.bf16.msra.mxu0 %v903_v18  ;;  %v952_v53 = vld [vmem:[#allocation7 + $0x8c] ss:$16 sps:$4 sm:$0xff]   ;;  %v947_v54 = vld [vmem:[#allocation7 + $0x80] ss:$16 sps:$4 sm:$0xff]   ;;  %v950_v55 = vld [vmem:[#allocation7 + $0x88] ss:$16 sps:$4 sm:$0xff]  }
  0x4b   :  { %861 = vmatpush3.bf16.msra.mxu1 %v904_v19  ;;  %840 = vmatprep.subr.bf16.mxu0 %v905_v20  ;;  %v955_v56 = vld [vmem:[#allocation7 + $0xa4] ss:$16 sps:$4 sm:$0xff]   ;;  %v958_v57 = vld [vmem:[#allocation7 + $0xac] ss:$16 sps:$4 sm:$0xff]   ;;  %v953_v58 = vld [vmem:[#allocation7 + $0xa0] ss:$16 sps:$4 sm:$0xff]  }
  0x4c   :  { %862 = vmatprep.subr.bf16.mxu1 %v906_v21  ;;  %v956_v59 = vld [vmem:[#allocation7 + $0xa8] ss:$16 sps:$4 sm:$0xff]   ;;  %v961_v60 = vld [vmem:[#allocation7 + $0xc4] ss:$16 sps:$4 sm:$0xff]   ;;  %v964_v61 = vld [vmem:[#allocation7 + $0xcc] ss:$16 sps:$4 sm:$0xff]  }
  0x4d   :  { %v959_v62 = vld [vmem:[#allocation7 + $0xc0] ss:$16 sps:$4 sm:$0xff]   ;;  %v962_v63 = vld [vmem:[#allocation7 + $0xc8] ss:$16 sps:$4 sm:$0xff]   ;;  %v967_v0 = vld [vmem:[#allocation7 + $0xe4] ss:$16 sps:$4 sm:$0xff]  }
  0x4e   :  { %841 = vmatpush3.bf16.msra.mxu0 %v907_v22  ;;  %v970_v1 = vld [vmem:[#allocation7 + $0xec] ss:$16 sps:$4 sm:$0xff]   ;;  %v965_v2 = vld [vmem:[#allocation7 + $0xe0] ss:$16 sps:$4 sm:$0xff]   ;;  %v968_v3 = vld [vmem:[#allocation7 + $0xe8] ss:$16 sps:$4 sm:$0xff]  }
  0x4f   :  { %863 = vmatpush3.bf16.msra.mxu1 %v908_v23  ;;  %842 = vmatprep.subr.bf16.mxu0 %v909_v24 }
  0x50   :  { %864 = vmatprep.subr.bf16.mxu1 %v910_v25  ;;  %v469_v25 = vlaneseq }
  0x52   :  { %843 = vmatpush3.bf16.msra.mxu0 %v911_v26  ;;  %v470_v26 = vshrl.u32 %v469_v25, 7 }
  0x53   :  { %865 = vmatpush3.bf16.msra.mxu1 %v912_v27  ;;  %844 = vmatprep.subr.bf16.mxu0 %v913_v28 }
  0x54   :  { %866 = vmatprep.subr.bf16.mxu1 %v914_v29  ;;  %v471_v27 = vsub.s32 0, %v470_v26  ;;  %v479_v28 = vsub.s32 2, %v470_v26  ;;  %v467_v29 = vld [vmem:[%s1164_s4] sm:$0xf]  ;;  %s1037_s4 = scalar_lea.vmem %s749_s9, 1024 }
  0x55   :  { %p1038_p10 = scmp.ne.s32.totalorder %s749_s9, %s1037_s4  ;;  %p1043_p12 = scmp.lt.s32.totalorder %s1037_s4, %s1037_s4 }
  0x56   :  { %845 = vmatpush3.bf16.msra.mxu0 %v915_v30  ;;  %v475_v30 = vsub.s32 1, %v470_v26  ;;  %v480_v33 = vrot.slane %v467_v29, %v479_v28 }
  0x57   :  { %867 = vmatpush3.bf16.msra.mxu1 %v916_v31  ;;  %649 = vmatprep.subr.bf16.mxu0 %v925_v37  ;;  %v483_v31 = vsub.s32 3, %v470_v26  ;;  %p1044_p13 = por %p1043_p12, %p1042_p11 }
  0x58   :  { %692 = vmatprep.subr.bf16.mxu1 %v928_v39 }
  0x59   :  { %383 = vmatmul.mubr.bf16.vlgmr.msra.gmra.mrb[0].mxu0 %v917_v32  ;;  %v472_v32 = vrot.slane %v467_v29, %v471_v27  ;;  %v484_v35 = vrot.slane %v467_v29, %v483_v31  ;;  %p1045_p0 = pnand %p1044_p13, %p1038_p10 }
  0x5a   :  { %424 = vmatmul.mubr.bf16.vlgmr.msra.gmra.mrb[0].mxu1 %v920_v34  ;;  %650 = vmatpush1.bf16.msra.mxu0 %v923_v36  ;;  %v476_v34 = vrot.slane %v467_v29, %v475_v30 }
  0x5b   :  { %693 = vmatpush1.bf16.msra.mxu1 %v926_v38  ;;  %651 = vmatprep.subr.bf16.mxu0 %v931_v41 }
  0x5c   :  { %694 = vmatprep.subr.bf16.mxu1 %v934_v42  ;;  %681 = vmatprep.mubr.bf16.mxu0 %v1072_v4 }
  0x5d   :  { %724 = vmatprep.mubr.bf16.mxu1 %v1072_v4 }
  0x5e   :  { %652 = vmatpush1.bf16.msra.mxu0 %v929_v40 }
  0x5f   :  { %653 = vmatprep.subr.bf16.mxu0 %v937_v44  ;;  %695 = vmatpush1.bf16.msra.mxu1 %v932_v43 }
  0x60   :  { %696 = vmatprep.subr.bf16.mxu1 %v940_v46 }
  0x62   :  { %654 = vmatpush1.bf16.msra.mxu0 %v935_v45 }
  0x63   :  { %655 = vmatprep.subr.bf16.mxu0 %v943_v47  ;;  %697 = vmatpush1.bf16.msra.mxu1 %v938_v48 }
  0x64   :  { %698 = vmatprep.subr.bf16.mxu1 %v946_v49 }
  0x66   :  { %656 = vmatpush1.bf16.msra.mxu0 %v941_v50 }
  0x67   :  { %657 = vmatprep.subr.bf16.mxu0 %v949_v52  ;;  %699 = vmatpush1.bf16.msra.mxu1 %v944_v51 }
  0x68   :  { %700 = vmatprep.subr.bf16.mxu1 %v952_v53 }
  0x6a   :  { %658 = vmatpush1.bf16.msra.mxu0 %v947_v54 }
  0x6b   :  { %701 = vmatpush1.bf16.msra.mxu1 %v950_v55  ;;  %659 = vmatprep.subr.bf16.mxu0 %v955_v56 }
  0x6c   :  { %702 = vmatprep.subr.bf16.mxu1 %v958_v57 }
  0x6e   :  { %660 = vmatpush1.bf16.msra.mxu0 %v953_v58 }
  0x6f   :  { %703 = vmatpush1.bf16.msra.mxu1 %v956_v59  ;;  %661 = vmatprep.subr.bf16.mxu0 %v961_v60 }
  0x70   :  { %704 = vmatprep.subr.bf16.mxu1 %v964_v61 }
  0x72   :  { %662 = vmatpush1.bf16.msra.mxu0 %v959_v62 }
  0x73   :  { %705 = vmatpush1.bf16.msra.mxu1 %v962_v63  ;;  %663 = vmatprep.subr.bf16.mxu0 %v967_v0 }
  0x74   :  { %706 = vmatprep.subr.bf16.mxu1 %v970_v1 }
  0x76   :  { %664 = vmatpush1.bf16.msra.mxu0 %v965_v2 }
  0x77   :  { %707 = vmatpush1.bf16.msra.mxu1 %v968_v3 }
 0x12c   :  { %v846_v5 = vpop.f32.mrb[0].mxu0 }
 0x12d   :  { %v868_v6 = vpop.f32.mrb[0].mxu1  ;;  %v847_v8 = vpop.f32.mrb[1].mxu0 }
 0x12e   :  { %v848_v9 = vadd.f32 %v847_v8, %v846_v5  ;;  %v869_v10 = vpop.f32.mrb[1].mxu1  ;;  %v849_v11 = vpop.f32.mrb[2].mxu0 }
 0x12f   :  { %v870_v12 = vadd.f32 %v869_v10, %v868_v6  ;;  %v871_v13 = vpop.f32.mrb[2].mxu1  ;;  %v850_v14 = vpop.f32.mrb[3].mxu0 }
 0x130   :  { %v385_v15 = vadd.f32 %v848_v9, %v761_v7  ;;  %v851_v16 = vadd.f32 %v850_v14, %v849_v11  ;;  %v872_v17 = vpop.f32.mrb[3].mxu1 }
 0x131   :  { %v873_v18 = vadd.f32 %v872_v17, %v871_v13 }
 0x132   :  { %v426_v19 = vadd.f32 %v870_v12, %v385_v15  ;;  %v388_v20 = vadd.f32 %v851_v16, %v761_v7 }
 0x134   :  { %v429_v21 = vadd.f32 %v873_v18, %v388_v20  ;;  %v432_v22 = vmax.f32 %v426_v19, 0.0 }
 0x136   :  { %v433_v23 = vmax.f32 %v429_v21, 0.0 }
 0x138   :  { %v434_v24 = vpack.c.bf16 %v433_v23, %v432_v22 }
 0x13a   :  { %682 = vmatmul.mubr.bf16.vlgmr.msra.gmra.mrb[4].mxu0 %v434_v24  ;;  %725 = vmatmul.mubr.bf16.vlgmr.msra.gmra.mrb[4].mxu1 %v434_v24 }
 0x20d   :  { %v683_v36 = vpop.f32.mrb[4].mxu0  ;;  %v726_v37 = vpop.f32.mrb[4].mxu1 }
 0x20e   :  { %v684_v38 = vadd.f32 %v683_v36, %v472_v32  ;;  %v727_v39 = vadd.f32 %v726_v37, %v480_v33  ;;  %v685_v40 = vpop.f32.mrb[5].mxu0  ;;  %v728_v41 = vpop.f32.mrb[5].mxu1 }
 0x20f   :  { %v686_v42 = vadd.f32 %v685_v40, %v476_v34  ;;  %v729_v43 = vadd.f32 %v728_v41, %v484_v35  ;;  %v687_v44 = vpop.f32.mrb[6].mxu0  ;;  %v730_v45 = vpop.f32.mrb[6].mxu1 }
 0x210   :  { %735 = vst [vmem:[#allocation8] sm:$0xff] %v684_v38  ;;  %737 = vst [vmem:[#allocation8 + $0x10] sm:$0xff] %v727_v39  ;;  %v688_v46 = vadd.f32 %v687_v44, %v472_v32  ;;  %v731_v47 = vadd.f32 %v730_v45, %v480_v33  ;;  %v689_v48 = vpop.f32.mrb[7].mxu0  ;;  %v732_v49 = vpop.f32.mrb[7].mxu1 }
 0x211   :  { %736 = vst [vmem:[#allocation8 + $0x8] sm:$0xff] %v686_v42  ;;  %738 = vst [vmem:[#allocation8 + $0x18] sm:$0xff] %v729_v43  ;;  %v690_v50 = vadd.f32 %v689_v48, %v476_v34  ;;  %v733_v51 = vadd.f32 %v732_v49, %v484_v35 }
 0x212   :  { %739 = vst [vmem:[#allocation8 + $0x20] sm:$0xff] %v688_v46  ;;  %741 = vst [vmem:[#allocation8 + $0x30] sm:$0xff] %v731_v47 }
 0x213   :  { %740 = vst [vmem:[#allocation8 + $0x28] sm:$0xff] %v690_v50  ;;  %742 = vst [vmem:[#allocation8 + $0x38] sm:$0xff] %v733_v51 }
 0x214   :  { %1048 = shalt.err (!%p1045_p0)
}
 0x215   :  { %s1049_s12 = scalar_lea.hbm %s1165_s5, 1024 }
 0x216   :  { %p1050_p1 = scmp.ne.s32.totalorder %s1165_s5, %s1049_s12  ;;  %p1053_p2 = scmp.lt.u32.totalorder %s1049_s12, %s1165_s5 }
 0x218   :  { %p1055_p3 = pnand %p1053_p2, %p1050_p1 }
 0x21a   :  { %1058 = shalt.err (!%p1055_p3)
}
 0x21b   :  { %s1074_s1 = smov 512   ;;  %s1075_s17 = smov 32  }
 0x21c   :  { %754 = dma.vmem_to_hbm [thread:$0]  %s749_s9, 1024, %s1165_s5, [#allocation4], %s1074_s1, %s1074_s1, %s1075_s17  }
 0x21d   :  { %1063 = dma.done.wait [#allocation4], 1024  }
 0x21e   :  { %1064 = vsyncadd [#allocation4], 4294966272 }
 0x21f   :  { %758 = vsyncpa [#allocation3], 1 }
 0x220   :  { %759 = vsyncpa [#allocation6], 1 }
 0x221   :  { %760 = vsyncpa [#allocation4], 1 }

</bundles_post_ra>
